<compile_context>
chip_gen: v6e
topology: v6e:2x2x1
jax: 0.10.0
libtpu: 0.0.40
codegen_flags: <defaults>
</compile_context>

<pallas_src>
import functools

import numpy as np
import jax
import jax.numpy as jnp
from jax.experimental import pallas as pl
from jax.experimental.pallas import tpu as pltpu


# ----------------------------------------------------------------------------
# Hardware-aware tiling helpers
# ----------------------------------------------------------------------------
def _hw_params():
    """Generation-aware (v5e/v6e vs v7x) VMEM limit and per-kernel tile budget."""
    try:
        vmem_phys = int(pltpu.get_tpu_info().vmem_capacity_bytes)
    except Exception:
        vmem_phys = 64 * 1024 * 1024                 # conservative: assume v7x (64 MiB/TC)
    if vmem_phys <= 64 * 1024 * 1024:                # v7x: 64 MiB VMEM, 2 TensorCores
        vmem_limit = 32 * 1024 * 1024
        tile_budget = 16 * 1024 * 1024               # double-buffered blocks << 64 MiB
    else:                                            # v5e / v6e: 128 MiB physical VMEM
        vmem_limit = 96 * 1024 * 1024
        tile_budget = 48 * 1024 * 1024
    return vmem_limit, tile_budget


def _choose_points_tile(P, per_col_bytes, budget, C):
    """Largest TP (multiple of 128 dividing P) whose double-buffered working set fits
    `budget`, while keeping >= ~4 grid blocks so both v7x TensorCores stay busy."""
    cap = max(128, (budget // per_col_bytes) // 128 * 128)
    if P <= cap:
        tp = P
    else:
        tp = None
        t = 128
        while t <= cap:
            if P % t == 0:
                tp = t
            t += 128
        if tp is None:
            # TODO(synk): P has no 128-multiple divisor <= cap; fall back to one tile
            # (could exceed the VMEM budget for very large, prime-ish P — pad P instead).
            tp = P
    while C * (P // tp) < 4 and tp % 256 == 0 and P % (tp // 2) == 0:
        tp //= 2
    return tp


# ----------------------------------------------------------------------------
# Pallas kernels (flat lane-dense layout: points on the lane axis)
# ----------------------------------------------------------------------------
def _adaptive_layer_kernel(x_ref, wt_ref, b_ref, o_ref, *, negative_slope):
    # x: (K, TP) bf16   wt: (1, N, K) bf16   b: (N, 1) f32   out: (N, TP) bf16
    y = jnp.dot(wt_ref[0], x_ref[...], preferred_element_type=jnp.float32) + b_ref[...]
    y = jnp.maximum(y, negative_slope * y)            # LeakyReLU(0.2): single VPU max
    o_ref[...] = y.astype(o_ref.dtype)


def _adaptive_tail_kernel(x_ref, wt_ref, b_ref, lw_ref, lb_ref, o_ref, *, negative_slope):
    # Last adaptive layer fused with the final nn.Linear (tiny (Nout, N) matmul in VMEM).
    h = jnp.dot(wt_ref[0], x_ref[...], preferred_element_type=jnp.float32) + b_ref[...]
    h = jnp.maximum(h, negative_slope * h)
    y = jnp.dot(lw_ref[...], h.astype(jnp.bfloat16),
                preferred_element_type=jnp.float32) + lb_ref[...]
    o_ref[...] = y                                     # (Nout, TP) f32, lane-dense


def adaptive_layer_flat(x_flat, wt, bt, *, C, negative_slope=0.2):
    """x_flat: (K, n) bf16 (columns grouped by this layer's tile), wt: (C, N, K) bf16,
    bt: (N, 1) f32 -> (N, n) bf16 in the same column grouping."""
    K, n = x_flat.shape
    N = wt.shape[1]
    P = n // C
    vmem_limit, budget = _hw_params()
    TP = _choose_points_tile(P, 2 * (K * 2 + N * 2), budget, C)
    bpt = P // TP
    kernel = functools.partial(_adaptive_layer_kernel, negative_slope=negative_slope)
    cost = pl.CostEstimate(flops=2 * C * P * N * K, transcendentals=0,
                           bytes_accessed=(K * n + N * n) * 2 + C * N * K * 2 + N * 4)
    return pl.pallas_call(
        kernel,
        out_shape=jax.ShapeDtypeStruct((N, n), jnp.bfloat16),
        grid_spec=pltpu.PrefetchScalarGridSpec(
            num_scalar_prefetch=0,
            grid=(C, bpt),                       # weight block index changes only with c
            in_specs=[
                # TODO(synk): on v5e consider pipeline_mode=pl.Buffered(3) here if
                # profiling shows exposed DMA.
                pl.BlockSpec((K, TP), lambda c, p: (0, c * bpt + p)),
                pl.BlockSpec((1, N, K), lambda c, p: (c, 0, 0)),
                pl.BlockSpec((N, 1), lambda c, p: (0, 0)),
            ],
            out_specs=pl.BlockSpec((N, TP), lambda c, p: (0, c * bpt + p)),
        ),
        compiler_params=pltpu.CompilerParams(
            dimension_semantics=("parallel", "parallel"),
            vmem_limit_bytes=vmem_limit),
        cost_estimate=cost,
    )(x_flat, wt, bt)


def adaptive_tail_flat(x_flat, wt, bt, lwt, lbt, *, C, negative_slope=0.2):
    """Last adaptive layer + fused final Linear.
    x_flat: (K, n) bf16, wt: (C, N, K) bf16, bt: (N, 1), lwt: (Nout, N) bf16,
    lbt: (Nout, 1) -> (Nout, n) float32."""
    K, n = x_flat.shape
    N = wt.shape[1]
    Nout = lwt.shape[0]
    P = n // C
    vmem_limit, budget = _hw_params()
    TP = _choose_points_tile(P, 2 * (K * 2 + Nout * 4), budget, C)
    bpt = P // TP
    kernel = functools.partial(_adaptive_tail_kernel, negative_slope=negative_slope)
    cost = pl.CostEstimate(
        flops=2 * C * P * N * K + 2 * n * Nout * N, transcendentals=0,
        bytes_accessed=K * n * 2 + C * N * K * 2 + Nout * N * 2 + (N + Nout) * 4 + Nout * n * 4)
    return pl.pallas_call(
        kernel,
        out_shape=jax.ShapeDtypeStruct((Nout, n), jnp.float32),
        grid_spec=pltpu.PrefetchScalarGridSpec(
            num_scalar_prefetch=0,
            grid=(C, bpt),
            in_specs=[
                pl.BlockSpec((K, TP), lambda c, p: (0, c * bpt + p)),
                pl.BlockSpec((1, N, K), lambda c, p: (c, 0, 0)),
                pl.BlockSpec((N, 1), lambda c, p: (0, 0)),
                pl.BlockSpec((Nout, N), lambda c, p: (0, 0)),
                pl.BlockSpec((Nout, 1), lambda c, p: (0, 0)),
            ],
            out_specs=pl.BlockSpec((Nout, TP), lambda c, p: (0, c * bpt + p)),
        ),
        compiler_params=pltpu.CompilerParams(
            dimension_semantics=("parallel", "parallel"),
            vmem_limit_bytes=vmem_limit),
        cost_estimate=cost,
    )(x_flat, wt, bt, lwt, lbt)


# ----------------------------------------------------------------------------
# Coordinate-only glue (NumPy, computed once outside jit) + parameter prep
# ----------------------------------------------------------------------------
def layer_tile_indices_np(x_f, tile_dims):
    """Replicates LoE.get_indices + coord_to_indices.  NOTE: the extra (x_f - 0.5) * 2
    is intentional — get_indices() re-normalizes coordinates that forward() already
    normalized (matches the PyTorch reference exactly)."""
    x2 = ((x_f - 0.5) * 2.0).astype(np.float32)
    d = x_f.shape[1]
    cum = np.ones((d,), np.float32)
    ids = []
    for td in tile_dims:
        td_arr = np.asarray(td, np.float32)
        cum = cum * td_arr
        axis_idx = np.floor(x2 * cum) % td_arr       # python-mod semantics == torch %
        Ld = len(td)
        idx = np.zeros((x_f.shape[0],), np.float32)
        for i in range(Ld):
            if i == Ld - 2:
                idx = idx + axis_idx[:, i] * float(td[-1])
            elif i == Ld - 1:
                idx = idx + axis_idx[:, i]
            else:
                idx = idx + axis_idx[:, i] * float(np.prod(td[i + 1:]))
        ids.append(idx.astype(np.int32))
    return ids


def precompute_permutations(x_np, labels_np, tile_dims):
    """Per-layer stable regroup orders + final inverse permutation.  Coordinates only,
    so this is hoisted completely out of the jitted forward pass."""
    x_f = (x_np / labels_np - 0.5) * 2.0
    tile_ids = layer_tile_indices_np(x_f, tile_dims)
    n = x_np.shape[0]
    perm = np.arange(n)
    orders = []
    for tid_full in tile_ids:
        order = np.argsort(tid_full[perm], kind="stable").astype(np.int32)
        orders.append(order)
        perm = perm[order]
    inv_perm = np.argsort(perm).astype(np.int32)     # gather index for the un-permute
    return [jnp.asarray(o) for o in orders], jnp.asarray(inv_perm), tile_ids


def prepare_params(adapt_w, adapt_b, last_w, last_b, pad_k0):
    """One-time parameter preprocessing (hoisted out of the forward pass): pad layer-0 K,
    transpose to (C, N, K), cast weights to bf16, reshape biases to column vectors."""
    wt_list, bt_list = [], []
    for li, (w, b) in enumerate(zip(adapt_w, adapt_b)):
        if li == 0 and w.shape[1] < pad_k0:
            w = jnp.pad(w, ((0, 0), (0, pad_k0 - w.shape[1]), (0, 0)))   # zero rows: exact
        wt_list.append(jnp.transpose(w, (0, 2, 1)).astype(jnp.bfloat16))  # (C, N, K)
        bt_list.append(jnp.reshape(b.astype(jnp.float32), (-1, 1)))       # (N, 1)
    lwt = last_w.astype(jnp.bfloat16)                                     # (Nout, N)
    lbt = jnp.reshape(last_b.astype(jnp.float32), (-1, 1))                # (Nout, 1)
    return wt_list, bt_list, lwt, lbt


def pos_encoding_rows(coords, num_freq):
    """NeRF positional encoding emitted directly in (K, n) row layout (points on lanes),
    with the exact torch column ordering."""
    rows = [coords[:, j] for j in range(coords.shape[1])]
    for i in range(num_freq):
        for j in range(coords.shape[1]):
            c = coords[:, j]
            rows.append(jnp.sin((2.0 ** i) * np.pi * c))
            rows.append(jnp.cos((2.0 ** i) * np.pi * c))
    return jnp.stack(rows, axis=0)


# ----------------------------------------------------------------------------
# Forward pass (tensorized / flex=False semantics)
# ----------------------------------------------------------------------------
def loe_forward(x, labels, wt_list, bt_list, lwt, lbt, orders, inv_perm, *,
                tile_dims, num_freq, pad_k0):
    """LoE.forward.  Activations stay in a flat, lane-dense (features, points) layout
    end-to-end; the only XLA-side data movement between Pallas calls is the per-layer
    column gather that regroups points by weight tile."""
    x_f = (x / labels - 0.5) * 2.0                       # x = (x / labels - 0.5) * 2
    h_t = pos_encoding_rows(x_f, num_freq)               # (pe_dim, n)
    if h_t.shape[0] < pad_k0:                            # zero-pad K to 16-aligned (layer 0)
        h_t = jnp.pad(h_t, ((0, pad_k0 - h_t.shape[0]), (0, 0)))
    h_t = h_t.astype(jnp.bfloat16)
    L = len(tile_dims)
    out_t = None
    for li, td in enumerate(tile_dims):
        C = int(np.prod(td))
        # regroup points (columns) by this layer's weight-tile id (precomputed indices)
        h_t = jnp.take(h_t, orders[li], axis=1)
        if li < L - 1:
            h_t = adaptive_layer_flat(h_t, wt_list[li], bt_list[li], C=C)
        else:
            out_t = adaptive_tail_flat(h_t, wt_list[li], bt_list[li], lwt, lbt, C=C)
    # un-permute only n x out_features values, as a gather with the inverse permutation
    return jnp.transpose(jnp.take(out_t, inv_perm, axis=1))        # (n, Nout) f32


def loe_reference_f32(x, labels, adapt_w, adapt_b, last_w, last_b, tile_ids, num_freq):
    """Pure-JAX f32 reference (per-point weight gather, no grouping) for validation."""
    x_f = (x / labels - 0.5) * 2.0
    h = jnp.transpose(pos_encoding_rows(x_f, num_freq))            # (n, pe_dim)
    for li, tid in enumerate(tile_ids):
        w_sel = adapt_w[li][jnp.asarray(tid)]                      # (n, K, N)
        y = jnp.einsum('nk,nko->no', h, w_sel) + adapt_b[li]
        h = jnp.where(y > 0, y, 0.2 * y)
    return h @ last_w.T + last_b


# ----------------------------------------------------------------------------
# Main: deterministic params + inputs, run once, validate against f32 reference
# ----------------------------------------------------------------------------
if __name__ == "__main__":
    in_features, out_features = 2, 3
    num_freq = 4
    dim_hidden = 32
    tile_dims = [[2, 2], [2, 2]]          # loe_configs.NET.dimensions
    img = 32                              # n = 1024 points, P = 256 points per weight tile

    # integer pixel-coordinate grid, labels = image dims (chosen so every weight tile
    # receives exactly n/prod(tile_dim) points -> tensorized / non-flex path is valid)
    ii, jj = jnp.meshgrid(jnp.arange(img, dtype=jnp.float32),
                          jnp.arange(img, dtype=jnp.float32), indexing="ij")
    x = jnp.stack([ii.reshape(-1), jj.reshape(-1)], axis=-1)        # (1024, 2)
    labels = jnp.array([img, img], dtype=jnp.float32)

    # deterministic parameter init (kaiming-uniform-like bounds, zero biases)
    key = jax.random.PRNGKey(0)
    keys = jax.random.split(key, len(tile_dims) + 1)
    pe_dim = in_features + 2 * in_features * num_freq               # 18
    pad_k0 = ((pe_dim + 15) // 16) * 16                             # 32: bf16 sublane aligned
    dims_in = [pe_dim] + [dim_hidden] * (len(tile_dims) - 1)

    adapt_w, adapt_b = [], []
    for li, td in enumerate(tile_dims):
        C, K, N = int(np.prod(td)), dims_in[li], dim_hidden
        bound = float(np.sqrt(6.0 / (K * N)))                       # fan_in = K*N for 3D weight
        adapt_w.append(jax.random.uniform(keys[li], (C, K, N), jnp.float32, -bound, bound))
        adapt_b.append(jnp.zeros((1, N), jnp.float32))              # bias[0] of (1,1,N)
    bound = float(np.sqrt(6.0 / dim_hidden))
    last_w = jax.random.uniform(keys[-1], (out_features, dim_hidden), jnp.float32, -bound, bound)
    last_b = jnp.zeros((out_features,), jnp.float32)

    # coordinate-only preprocessing (tile ids, per-layer regroup orders, inverse perm)
    orders, inv_perm, tile_ids = precompute_permutations(
        np.asarray(x), np.asarray(labels), tile_dims)
    for li, tid in enumerate(tile_ids):      # tensorized path requires equal points/tile
        counts = np.bincount(tid, minlength=int(np.prod(tile_dims[li])))
        assert np.all(counts == x.shape[0] // int(np.prod(tile_dims[li]))), counts

    # one-time weight prep (transpose / bf16 cast / bias reshape), hoisted out of the jit
    wt_list, bt_list, lwt, lbt = prepare_params(adapt_w, adapt_b, last_w, last_b, pad_k0)

    # TODO(synk): flex=True (ragged points-per-tile, list-of-tensors) path is not
    # expressible with static Pallas block shapes; only tensorized (flex=False) semantics.
    fwd = jax.jit(functools.partial(loe_forward, tile_dims=tile_dims,
                                    num_freq=num_freq, pad_k0=pad_k0))
    out = jax.block_until_ready(fwd(x, labels, wt_list, bt_list, lwt, lbt, orders, inv_perm))
    assert out.shape == (x.shape[0], out_features) and out.dtype == jnp.float32

    # validate bf16 kernel path against an f32 pure-JAX reference (generous tolerance)
    ref = loe_reference_f32(x, labels, adapt_w, adapt_b, last_w, last_b, tile_ids, num_freq)
    np.testing.assert_allclose(np.asarray(out), np.asarray(ref), atol=3e-2, rtol=3e-2)
    print("KERNEL_OK")
</pallas_src>

<mosaic_0001>
module attributes {stable_mosaic.version = 11 : i64} {
  func.func @_adaptive_layer_kernel(%arg0: i32, %arg1: i32, %arg2: memref<32x256xbf16, #tpu.memory_space<vmem>>, %arg3: memref<1x32x32xbf16, #tpu.memory_space<vmem>>, %arg4: memref<32x1xf32, #tpu.memory_space<vmem>>, %arg5: memref<32x256xbf16, #tpu.memory_space<vmem>>) attributes {dimension_semantics = [#tpu.dimension_semantics<parallel>, #tpu.dimension_semantics<parallel>], iteration_bounds = array<i64: 4, 1>, scalar_prefetch = 0 : i64, scratch_operands = 0 : i64, tpu.core_type = #tpu.core_type<tc>, window_params = [{transform_indices = @transform_0, window_bounds = array<i64: 32, 256>}, {transform_indices = @transform_1, window_bounds = array<i64: 1, 32, 32>}, {pipeline_mode = #tpu.pipeline_mode<synchronous>, transform_indices = @transform_2, window_bounds = array<i64: 32, 1>}, {transform_indices = @transform_3, window_bounds = array<i64: 32, 256>}]} {
    %c0 = arith.constant 0 : index
    %c0_0 = arith.constant 0 : index
    %c0_1 = arith.constant 0 : index
    %0 = vector.load %arg3[%c0, %c0_0, %c0_1] : memref<1x32x32xbf16, #tpu.memory_space<vmem>>, vector<1x32x32xbf16>
    %1 = vector.shape_cast %0 : vector<1x32x32xbf16> to vector<32x32xbf16>
    %c0_2 = arith.constant 0 : index
    %c0_3 = arith.constant 0 : index
    %2 = vector.load %arg2[%c0_2, %c0_3] : memref<32x256xbf16, #tpu.memory_space<vmem>>, vector<32x256xbf16>
    %cst = arith.constant dense<0.000000e+00> : vector<32x256xf32>
    %3 = tpu.matmul %1, %2, %cst {dimension_numbers = #tpu.dot_dimension_numbers<[1], [0], [0], [1], [0, 0, 1, 1], [], []>} : vector<32x32xbf16>, vector<32x256xbf16>, vector<32x256xf32> -> vector<32x256xf32>
    %c0_4 = arith.constant 0 : index
    %c0_5 = arith.constant 0 : index
    %4 = vector.load %arg4[%c0_4, %c0_5] : memref<32x1xf32, #tpu.memory_space<vmem>>, vector<32x1xf32>
    %5 = vector.broadcast %4 : vector<32x1xf32> to vector<32x256xf32>
    %6 = arith.addf %3, %5 : vector<32x256xf32>
    %cst_6 = arith.constant 2.000000e-01 : f32
    %7 = vector.broadcast %cst_6 : f32 to vector<32x256xf32>
    %8 = arith.mulf %7, %6 : vector<32x256xf32>
    %9 = arith.maximumf %6, %8 : vector<32x256xf32>
    %10 = arith.truncf %9 : vector<32x256xf32> to vector<32x256xbf16>
    %c0_7 = arith.constant 0 : index
    %c0_8 = arith.constant 0 : index
    %11 = vector.load %arg5[%c0_7, %c0_8] : memref<32x256xbf16, #tpu.memory_space<vmem>>, vector<32x256xbf16>
    tpu.vector_store %arg5[%c0_7, %c0_8], %10 {strides = array<i32>} : memref<32x256xbf16, #tpu.memory_space<vmem>>, vector<32x256xbf16>,
    return
  }
  func.func @transform_0(%arg0: i32, %arg1: i32) -> (i32, i32) {
    %c1_i32 = arith.constant 1 : i32
    %0 = arith.muli %arg0, %c1_i32 : i32
    %1 = arith.addi %0, %arg1 : i32
    %c0_i32 = arith.constant 0 : i32
    %c0_i32_0 = arith.constant 0 : i32
    return %c0_i32, %1 : i32, i32
  }
  func.func @transform_1(%arg0: i32, %arg1: i32) -> (i32, i32, i32) {
    %c0_i32 = arith.constant 0 : i32
    %c0_i32_0 = arith.constant 0 : i32
    %c0_i32_1 = arith.constant 0 : i32
    return %arg0, %c0_i32, %c0_i32_0 : i32, i32, i32
  }
  func.func @transform_2(%arg0: i32, %arg1: i32) -> (i32, i32) {
    %c0_i32 = arith.constant 0 : i32
    %c0_i32_0 = arith.constant 0 : i32
    %c0_i32_1 = arith.constant 0 : i32
    return %c0_i32, %c0_i32_0 : i32, i32
  }
  func.func @transform_3(%arg0: i32, %arg1: i32) -> (i32, i32) {
    %c1_i32 = arith.constant 1 : i32
    %0 = arith.muli %arg0, %c1_i32 : i32
    %1 = arith.addi %0, %arg1 : i32
    %c0_i32 = arith.constant 0 : i32
    %c0_i32_0 = arith.constant 0 : i32
    return %c0_i32, %1 : i32, i32
  }
}

module attributes {stable_mosaic.version = 11 : i64} {
  func.func @_adaptive_tail_kernel(%arg0: i32, %arg1: i32, %arg2: memref<32x256xbf16, #tpu.memory_space<vmem>>, %arg3: memref<1x32x32xbf16, #tpu.memory_space<vmem>>, %arg4: memref<32x1xf32, #tpu.memory_space<vmem>>, %arg5: memref<3x32xbf16, #tpu.memory_space<vmem>>, %arg6: memref<3x1xf32, #tpu.memory_space<vmem>>, %arg7: memref<3x256xf32, #tpu.memory_space<vmem>>) attributes {dimension_semantics = [#tpu.dimension_semantics<parallel>, #tpu.dimension_semantics<parallel>], iteration_bounds = array<i64: 4, 1>, scalar_prefetch = 0 : i64, scratch_operands = 0 : i64, tpu.core_type = #tpu.core_type<tc>, window_params = [{transform_indices = @transform_0, window_bounds = array<i64: 32, 256>}, {transform_indices = @transform_1, window_bounds = array<i64: 1, 32, 32>}, {pipeline_mode = #tpu.pipeline_mode<synchronous>, transform_indices = @transform_2, window_bounds = array<i64: 32, 1>}, {pipeline_mode = #tpu.pipeline_mode<synchronous>, transform_indices = @transform_3, window_bounds = array<i64: 3, 32>}, {pipeline_mode = #tpu.pipeline_mode<synchronous>, transform_indices = @transform_4, window_bounds = array<i64: 3, 1>}, {transform_indices = @transform_5, window_bounds = array<i64: 3, 256>}]} {
    %c0 = arith.constant 0 : index
    %c0_0 = arith.constant 0 : index
    %c0_1 = arith.constant 0 : index
    %0 = vector.load %arg3[%c0, %c0_0, %c0_1] : memref<1x32x32xbf16, #tpu.memory_space<vmem>>, vector<1x32x32xbf16>
    %1 = vector.shape_cast %0 : vector<1x32x32xbf16> to vector<32x32xbf16>
    %c0_2 = arith.constant 0 : index
    %c0_3 = arith.constant 0 : index
    %2 = vector.load %arg2[%c0_2, %c0_3] : memref<32x256xbf16, #tpu.memory_space<vmem>>, vector<32x256xbf16>
    %cst = arith.constant dense<0.000000e+00> : vector<32x256xf32>
    %3 = tpu.matmul %1, %2, %cst {dimension_numbers = #tpu.dot_dimension_numbers<[1], [0], [0], [1], [0, 0, 1, 1], [], []>} : vector<32x32xbf16>, vector<32x256xbf16>, vector<32x256xf32> -> vector<32x256xf32>
    %c0_4 = arith.constant 0 : index
    %c0_5 = arith.constant 0 : index
    %4 = vector.load %arg4[%c0_4, %c0_5] : memref<32x1xf32, #tpu.memory_space<vmem>>, vector<32x1xf32>
    %5 = vector.broadcast %4 : vector<32x1xf32> to vector<32x256xf32>
    %6 = arith.addf %3, %5 : vector<32x256xf32>
    %cst_6 = arith.constant 2.000000e-01 : f32
    %7 = vector.broadcast %cst_6 : f32 to vector<32x256xf32>
    %8 = arith.mulf %7, %6 : vector<32x256xf32>
    %9 = arith.maximumf %6, %8 : vector<32x256xf32>
    %c0_7 = arith.constant 0 : index
    %c0_8 = arith.constant 0 : index
    %10 = vector.load %arg5[%c0_7, %c0_8] : memref<3x32xbf16, #tpu.memory_space<vmem>>, vector<3x32xbf16>
    %11 = arith.truncf %9 : vector<32x256xf32> to vector<32x256xbf16>
    %cst_9 = arith.constant dense<0.000000e+00> : vector<3x256xf32>
    %12 = tpu.matmul %10, %11, %cst_9 {dimension_numbers = #tpu.dot_dimension_numbers<[1], [0], [0], [1], [0, 0, 1, 1], [], []>} : vector<3x32xbf16>, vector<32x256xbf16>, vector<3x256xf32> -> vector<3x256xf32>
    %c0_10 = arith.constant 0 : index
    %c0_11 = arith.constant 0 : index
    %13 = vector.load %arg6[%c0_10, %c0_11] : memref<3x1xf32, #tpu.memory_space<vmem>>, vector<3x1xf32>
    %14 = vector.broadcast %13 : vector<3x1xf32> to vector<3x256xf32>
    %15 = arith.addf %12, %14 : vector<3x256xf32>
    %c0_12 = arith.constant 0 : index
    %c0_13 = arith.constant 0 : index
    %16 = vector.load %arg7[%c0_12, %c0_13] : memref<3x256xf32, #tpu.memory_space<vmem>>, vector<3x256xf32>
    tpu.vector_store %arg7[%c0_12, %c0_13], %15 {strides = array<i32>} : memref<3x256xf32, #tpu.memory_space<vmem>>, vector<3x256xf32>,
    return
  }
  func.func @transform_0(%arg0: i32, %arg1: i32) -> (i32, i32) {
    %c1_i32 = arith.constant 1 : i32
    %0 = arith.muli %arg0, %c1_i32 : i32
    %1 = arith.addi %0, %arg1 : i32
    %c0_i32 = arith.constant 0 : i32
    %c0_i32_0 = arith.constant 0 : i32
    return %c0_i32, %1 : i32, i32
  }
  func.func @transform_1(%arg0: i32, %arg1: i32) -> (i32, i32, i32) {
    %c0_i32 = arith.constant 0 : i32
    %c0_i32_0 = arith.constant 0 : i32
    %c0_i32_1 = arith.constant 0 : i32
    return %arg0, %c0_i32, %c0_i32_0 : i32, i32, i32
  }
  func.func @transform_2(%arg0: i32, %arg1: i32) -> (i32, i32) {
    %c0_i32 = arith.constant 0 : i32
    %c0_i32_0 = arith.constant 0 : i32
    %c0_i32_1 = arith.constant 0 : i32
    return %c0_i32, %c0_i32_0 : i32, i32
  }
  func.func @transform_3(%arg0: i32, %arg1: i32) -> (i32, i32) {
    %c0_i32 = arith.constant 0 : i32
    %c0_i32_0 = arith.constant 0 : i32
    %c0_i32_1 = arith.constant 0 : i32
    return %c0_i32, %c0_i32_0 : i32, i32
  }
  func.func @transform_4(%arg0: i32, %arg1: i32) -> (i32, i32) {
    %c0_i32 = arith.constant 0 : i32
    %c0_i32_0 = arith.constant 0 : i32
    %c0_i32_1 = arith.constant 0 : i32
    return %c0_i32, %c0_i32_0 : i32, i32
  }
  func.func @transform_5(%arg0: i32, %arg1: i32) -> (i32, i32) {
    %c1_i32 = arith.constant 1 : i32
    %0 = arith.muli %arg0, %c1_i32 : i32
    %1 = arith.addi %0, %arg1 : i32
    %c0_i32 = arith.constant 0 : i32
    %c0_i32_0 = arith.constant 0 : i32
    return %c0_i32, %1 : i32, i32
  }
}

</mosaic_0001>

<bundles_post_ra>
// kernel: loe_forward.2
= control target key start
LH: loop header
LB: loop body
LE: loop exit
PB: predicated region body
PF: predicated region fallthrough
CT: control target
= control target key end

     0   :  { %s708_s12 = smov 0   ;;  %s710_s13 = smov 0   ;;  %s801_s0 = inlined_call_operand.vmem [shape: bf16[32,1024], index: 0, kind: input, shape index: {}]   ;;  %s802_s1 = inlined_call_operand.vmem [shape: bf16[4,32,32], index: 1, kind: input, shape index: {}]   ;;  %s803_s2 = inlined_call_operand.vmem [shape: f32[32,1], index: 2, kind: input, shape index: {}]   ;;  %s804_s3 = inlined_call_operand.vmem [shape: bf16[32,1024], index: 3, kind: output, shape index: {}]  }
   0x1   :  { %s712_s14 = smov 0   ;;  %s714_s15 = smov 0  }
   0x2   :  { %s716_s16 = smov 0  }
   0x3 LB: > { %s25_s17 = sadd.s32 1, %s681_s15  ;;  %s556_s18 = sadd.s32 4294967295, %s685_s16   ;;  %s685_s16 = sphi %s716_s16, %s13_s16   ;;  %s681_s15 = sphi %s714_s15, %s809_s15   ;;  %s677_s14 = sphi %s712_s14, %s808_s14   ;;  %s673_s13 = sphi %s710_s13, %s807_s13   ;;  %s669_s12 = sphi %s708_s12, %s806_s12  }
   0x4   : > { %p27_p0 = scmp.ge.s32.totalorder %s25_s17, 4  ;;  %p41_p1 = scmp.ne.s32.totalorder %s673_s13, %s669_s12 }
   0x5   : > { %p42_p2 = scmp.eq.s32.totalorder %s685_s16, 0  ;;  %p120_p4 = scmp.eq.s32.totalorder %s556_s18, 3 }
   0x6   : > { %s811_s17 = smov (%p27_p0, %s25_s17), 0  ;;  %s34_s20 = sadd.s32 1, %s673_s13 }
   0x7   : > { %p43_p3 = por %p42_p2, %p41_p1  ;;  %s31_s19 = ssub.s32 %s681_s15, %s811_s17 }
   0x8   : > { %p32_p5 = scmp.eq.s32.totalorder %s31_s19, 0  ;;  %p743_p6 = por %p120_p4, %p41_p1 }
   0x9   : > { %p559_p7 = scmp.ge.s32.totalorder %s685_s16, 4 }
   0xa   : > { %s748_s22 = scalar_select %p32_p5, %s673_s13, %s34_s20  }
   0xb   : > { %145 = sbr.rel (%p559_p7) target bundleno = 24 (0x18), region = 20 }
  0x10   : > { %148 = sbr.rel (!%p43_p3) target bundleno = 24 (0x18), region = 24  ;;  %s150_s23 = sand.u32 (%p43_p3), 1, %s673_s13  }
  0x11   : > { %s585_s24 = sshll.u32 (%p43_p3), %s681_s15, 3  ;;  %s560_s25 = sshll.u32 (%p43_p3), %s150_s23, 5 }
  0x12   : > { %s156_s28 = scalar_lea.vmem (%p43_p3), %s801_s0, %s585_s24  ;;  %s152_s29 = scalar_lea.vmem (%p43_p3), [#allocation2], %s560_s25 }
  0x13   : > { %v191_v0 = vld [vmem:[%s156_s28] sm:$0xff] (%p43_p3) }
  0x14   : > { %v193_v1 = vld [vmem:[%s156_s28 + $0x20] sm:$0xff] (%p43_p3)  ;;  %192 = vst [vmem:[%s152_s29] sm:$0xff] (%p43_p3), %v191_v0 }
  0x15   : > { %v195_v2 = vld [vmem:[%s156_s28 + $0x40] sm:$0xff]  ;;  %194 = vst [vmem:[%s152_s29 + $0x8] sm:$0xff] %v193_v1 }
  0x16   : > { %196 = vst [vmem:[%s152_s29 + $0x10] sm:$0xff] %v195_v2  ;;  %v197_v3 = vld [vmem:[%s156_s28 + $0x60] sm:$0xff] }
  0x17   : > { %198 = vst [vmem:[%s152_s29 + $0x18] sm:$0xff] %v197_v3 }
  0x18 PF: > { %p563_p8 = scmp.ge.s32.totalorder %s685_s16, 1  ;;  %p211_p9 = scmp.lt.s32.totalorder %s685_s16, 5 }
  0x1a   : > { %p212_p10 = pnand %p563_p8, %p211_p9 }
  0x1b   : > { %s218_s30 = sand.u32 (!%p212_p10), 1, %s669_s12   ;;  %p247_p11 = scmp.lt.s32.totalorder (!%p212_p10), %s677_s14, 3 }
  0x1c   : > { %215 = sbr.rel (%p212_p10) target bundleno = 261 (0x105), region = 66  ;;  %s766_s8 = sshll.u32 (!%p212_p10), %s218_s30, 5 }
  0x1d   : > { %s220_s9 = scalar_lea.vmem (!%p212_p10), [#allocation2], %s766_s8  ;;  %s244_s26 = scalar_lea.vmem (!%p212_p10), [#allocation3], %s766_s8 }
  0x21   : > { %v265_v4 = vld [vmem:[%s803_s2 + $0x10] sm:$0xff]  ;;  %v263_v5 = vld [vmem:[%s803_s2] sm:$0xff]  ;;  %v687_v6 = vmov 0   ;;  %s248_s10 = scalar_select %p247_p11, %s677_s14, 3  ;;  %v266_v10 = vld [vmem:[%s803_s2 + $0x18] sm:$0xff]  ;;  %vm317_vm0 = vcmask 261120  }
  0x22   : > { %356 = vmatprep.mubr.bf16.mxu0 %v687_v6  ;;  %366 = vmatprep.mubr.bf16.mxu1 %v687_v6  ;;  %v639_v7 = vld [vmem:[%s220_s9 + $0x14] ss:$8 sps:$4 sm:$0xff]   ;;  %v641_v8 = vld [vmem:[%s220_s9 + $0x10] ss:$8 sps:$4 sm:$0xff]   ;;  %v642_v9 = vld [vmem:[%s220_s9 + $0x4] ss:$8 sps:$4 sm:$0xff]  }
  0x23   : > { %638 = vset.pattern.permute.xlu1 %v687_v6  ;;  %637 = vset.pattern.permute.xlu0 %v687_v6  ;;  %s586_s11 = sshll.u32 %s248_s10, 4  ;;  %v264_v11 = vld [vmem:[%s803_s2 + $0x8] sm:$0xff]  ;;  %s591_s27 = sshll.u32 (%p743_p6), %s677_s14, 3 }
  0x24   : > { %279 = vperm.xlu1 %638, %v265_v4   ;;  %269 = vperm.xlu0 %637, %v263_v5   ;;  %v644_v12 = vld [vmem:[%s220_s9] ss:$8 sps:$4 sm:$0xff]   ;;  %s251_s25 = scalar_lea.vmem %s802_s1, %s586_s11  ;;  %s431_s30 = scalar_lea.vmem (%p743_p6), %s804_s3, %s591_s27 }
  0x25   : > { %336 = vmatprep.subr.bf16.mxu0 %v639_v7  ;;  %592 = vmatprep.subr.bf16.mxu1 %v639_v7  ;;  %v645_v13 = vld [vmem:[%s251_s25] sm:$0xff]   ;;  %v646_v14 = vld [vmem:[%s251_s25 + $0x8] sm:$0xff]  }
  0x26   : > { %337 = vmatpush1.bf16.msra.mxu0 %v641_v8  ;;  %594 = vmatpush1.bf16.msra.mxu1 %v641_v8 }
  0x27   : > { %338 = vmatprep.subr.bf16.mxu0 %v642_v9  ;;  %593 = vmatprep.subr.bf16.mxu1 %v642_v9 }
  0x28   : > { %284 = vperm.xlu1 %638, %v266_v10   ;;  %274 = vperm.xlu0 %637, %v264_v11  }
  0x2a   : > { %339 = vmatpush1.bf16.msra.mxu0 %v644_v12  ;;  %595 = vmatpush1.bf16.msra.mxu1 %v644_v12 }
  0x2d   : > { %574 = vmatmul.mubr.msk.bf16.vlgmr.msra.gmra.mxu0 %vm317_vm0, %v645_v13  ;;  %575 = vmatmul.mubr.msk.bf16.vlgmr.msra.gmra.mxu1 %vm317_vm0, %v646_v14 }
  0x9f   : > { %v280_v15 = vpop.permute.xlu1 %279  ;;  %v270_v16 = vpop.permute.xlu0 %269 }
  0xa3   : > { %v285_v29 = vpop.permute.xlu1 %284  ;;  %v275_v30 = vpop.permute.xlu0 %274 }
  0xed   : > { %v358_v17 = vpop.f32.mrf.mxu0  ;;  %v368_v18 = vpop.f32.mrf.mxu1 }
  0xee   : > { %v359_v19 = vadd.f32 %v358_v17, %v270_v16  ;;  %v369_v20 = vadd.f32 %v368_v18, %v280_v15 }
  0xef   : > { %v360_v21 = vpop.f32.mrf.mxu0  ;;  %v370_v22 = vpop.f32.mrf.mxu1 }
  0xf0   : > { %v377_v23 = vmul.f32 0.2, %v359_v19  ;;  %v381_v24 = vmul.f32 0.2, %v369_v20  ;;  %v361_v25 = vadd.f32 %v360_v21, %v270_v16  ;;  %v371_v26 = vadd.f32 %v370_v22, %v280_v15 }
  0xf1   : > { %v362_v27 = vpop.f32.mrf.mxu0  ;;  %v372_v28 = vpop.f32.mrf.mxu1 }
  0xf2   : > { %v378_v31 = vmul.f32 0.2, %v361_v25  ;;  %v382_v32 = vmul.f32 0.2, %v371_v26  ;;  %v385_v33 = vmax.f32 %v359_v19, %v377_v23  ;;  %v389_v34 = vmax.f32 %v369_v20, %v381_v24 }
  0xf3   : > { %v363_v35 = vadd.f32 %v362_v27, %v275_v30  ;;  %v373_v36 = vadd.f32 %v372_v28, %v285_v29  ;;  %v364_v37 = vpop.f32.mrf.mxu0  ;;  %v374_v38 = vpop.f32.mrf.mxu1 }
  0xf4   : > { %v386_v39 = vmax.f32 %v361_v25, %v378_v31  ;;  %v390_v40 = vmax.f32 %v371_v26, %v382_v32  ;;  %v365_v41 = vadd.f32 %v364_v37, %v275_v30  ;;  %v375_v42 = vadd.f32 %v374_v38, %v285_v29 }
  0xf5   : > { %v379_v43 = vmul.f32 0.2, %v363_v35  ;;  %v383_v44 = vmul.f32 0.2, %v373_v36 }
  0xf6   : > { %v587_v45 = vpack.c.bf16 %v386_v39, %v385_v33  ;;  %v589_v46 = vpack.c.bf16 %v390_v40, %v389_v34  ;;  %v380_v47 = vmul.f32 0.2, %v365_v41  ;;  %v384_v48 = vmul.f32 0.2, %v375_v42 }
  0xf7   : > { %v387_v49 = vmax.f32 %v363_v35, %v379_v43  ;;  %v391_v50 = vmax.f32 %v373_v36, %v383_v44 }
  0xf8   : > { %417 = vst [vmem:[%s244_s26] sm:$0xff] %v587_v45  ;;  %419 = vst [vmem:[%s244_s26 + $0x10] sm:$0xff] %v589_v46  ;;  %v388_v51 = vmax.f32 %v365_v41, %v380_v47  ;;  %v392_v52 = vmax.f32 %v375_v42, %v384_v48  ;;  %427 = sbr.rel (!%p743_p6) target bundleno = 261 (0x105), region = 74 }
  0xfa   : > { %v588_v53 = vpack.c.bf16 %v388_v51, %v387_v49  ;;  %v590_v54 = vpack.c.bf16 %v392_v52, %v391_v50 }
  0xfc   : > { %418 = vst [vmem:[%s244_s26 + $0x8] sm:$0xff] %v588_v53  ;;  %420 = vst [vmem:[%s244_s26 + $0x18] sm:$0xff] %v590_v54 }
  0xff   : > { %v466_v55 = vld [vmem:[%s244_s26] sm:$0xff]  ;;  %v470_v57 = vld [vmem:[%s244_s26 + $0x10] sm:$0xff] }
 0x100   : > { %467 = vst [vmem:[%s431_s30] sm:$0xff] %v466_v55  ;;  %471 = vst [vmem:[%s431_s30 + $0x40] sm:$0xff] %v470_v57 }
 0x103   : > { %v468_v56 = vld [vmem:[%s244_s26 + $0x8] sm:$0xff]  ;;  %v472_v58 = vld [vmem:[%s244_s26 + $0x18] sm:$0xff] }
 0x104   : > { %469 = vst [vmem:[%s431_s30 + $0x20] sm:$0xff] %v468_v56  ;;  %473 = vst [vmem:[%s431_s30 + $0x60] sm:$0xff] %v472_v58 }
 0x105 PF: > { %s13_s16 = sadd.s32 1, %s685_s16   ;;  %s806_s12 = smov %s673_s13 }
 0x106   : > { %p10_p12 = scmp.ge.s32.totalorder %s13_s16, 6   ;;  %s807_s13 = smov %s748_s22 }
 0x107   : > { %s808_s14 = smov %s681_s15  ;;  %s809_s15 = smov %s811_s17 }
 0x108   :  { %12 = sbr.rel (!%p10_p12) target bundleno = 3 (0x3), region = 146 }

// kernel: loe_forward.3
= control target key start
LH: loop header
LB: loop body
LE: loop exit
PB: predicated region body
PF: predicated region fallthrough
CT: control target
= control target key end

     0   :  { %s750_s18 = smov 0   ;;  %s752_s19 = smov 0   ;;  %s841_s0 = inlined_call_operand.vmem [shape: bf16[32,1024], index: 0, kind: input, shape index: {}]   ;;  %s842_s1 = inlined_call_operand.vmem [shape: bf16[4,32,32], index: 1, kind: input, shape index: {}]   ;;  %s843_s2 = inlined_call_operand.vmem [shape: f32[32,1], index: 2, kind: input, shape index: {}]   ;;  %s844_s3 = inlined_call_operand.vmem [shape: bf16[3,32], index: 3, kind: input, shape index: {}]   ;;  %s845_s4 = inlined_call_operand.vmem [shape: f32[3,1], index: 4, kind: input, shape index: {}]   ;;  %s846_s5 = inlined_call_operand.vmem [shape: f32[3,1024], index: 5, kind: output, shape index: {}]  }
   0x1   :  { %s754_s20 = smov 0   ;;  %s756_s21 = smov 0  }
   0x2   :  { %s758_s22 = smov 0  }
   0x3 LB: > { %s27_s23 = sadd.s32 1, %s713_s21  ;;  %p43_p1 = scmp.ne.s32.totalorder %s705_s19, %s701_s18  ;;  %s717_s22 = sphi %s758_s22, %s15_s22   ;;  %s713_s21 = sphi %s756_s21, %s850_s21   ;;  %s709_s20 = sphi %s754_s20, %s849_s20   ;;  %s705_s19 = sphi %s752_s19, %s848_s19   ;;  %s701_s18 = sphi %s750_s18, %s847_s18  }
   0x4   : > { %p29_p0 = scmp.ge.s32.totalorder %s27_s23, 4  ;;  %p44_p2 = scmp.eq.s32.totalorder %s717_s22, 0 }
   0x5   : > { %s36_s25 = sadd.s32 1, %s705_s19  ;;  %p605_p5 = scmp.ge.s32.totalorder %s717_s22, 4 }
   0x6   : > { %s852_s23 = smov (%p29_p0, %s27_s23), 0  ;;  %p45_p3 = por %p44_p2, %p43_p1 }
   0x7   : > { %s33_s24 = ssub.s32 %s713_s21, %s852_s23  ;;  %195 = sbr.rel (%p605_p5) target bundleno = 20 (0x14), region = 28 }
   0x8   : > { %p34_p4 = scmp.eq.s32.totalorder %s33_s24, 0 }
   0xa   : > { %s785_s26 = scalar_select %p34_p4, %s705_s19, %s36_s25  }
   0xc   : > { %198 = sbr.rel (!%p45_p3) target bundleno = 20 (0x14), region = 32  ;;  %s200_s27 = sand.u32 (%p45_p3), 1, %s705_s19  }
   0xd   : > { %s626_s28 = sshll.u32 (%p45_p3), %s713_s21, 3  ;;  %s606_s29 = sshll.u32 (%p45_p3), %s200_s27, 5 }
   0xe   : > { %s206_s7 = scalar_lea.vmem (%p45_p3), %s841_s0, %s626_s28  ;;  %s202_s8 = scalar_lea.vmem (%p45_p3), [#allocation2], %s606_s29 }
   0xf   : > { %v241_v0 = vld [vmem:[%s206_s7] sm:$0xff] (%p45_p3) }
  0x10   : > { %v243_v1 = vld [vmem:[%s206_s7 + $0x20] sm:$0xff] (%p45_p3)  ;;  %242 = vst [vmem:[%s202_s8] sm:$0xff] (%p45_p3), %v241_v0 }
  0x11   : > { %v245_v2 = vld [vmem:[%s206_s7 + $0x40] sm:$0xff]  ;;  %244 = vst [vmem:[%s202_s8 + $0x8] sm:$0xff] %v243_v1 }
  0x12   : > { %246 = vst [vmem:[%s202_s8 + $0x10] sm:$0xff] %v245_v2  ;;  %v247_v3 = vld [vmem:[%s206_s7 + $0x60] sm:$0xff] }
  0x13   : > { %248 = vst [vmem:[%s202_s8 + $0x18] sm:$0xff] %v247_v3 }
  0x14 PF: > { %p609_p6 = scmp.ge.s32.totalorder %s717_s22, 1  ;;  %p261_p7 = scmp.lt.s32.totalorder %s717_s22, 5 }
  0x16   : > { %p262_p8 = pnand %p609_p6, %p261_p7 }
  0x17   : > { %s268_s9 = sand.u32 (!%p262_p8), 1, %s701_s18   ;;  %p303_p9 = scmp.lt.s32.totalorder (!%p262_p8), %s709_s20, 3 }
  0x18   : > { %265 = sbr.rel (%p262_p8) target bundleno = 464 (0x1d0), region = 74  ;;  %s610_s14 = sshll.u32 (!%p262_p8), %s268_s9, 5 }
  0x19   : > { %s270_s24 = scalar_lea.vmem (!%p262_p8), [#allocation2], %s610_s14  ;;  %s613_s10 = sshll.u32 (!%p262_p8), %s709_s20, 1 }
  0x1a   : > { %p310_p10 = scmp.lt.s32.totalorder (!%p262_p8), %s613_s10, 7 }
  0x1d   : > { %v325_v4 = vld [vmem:[%s843_s2] sm:$0xff]  ;;  %v327_v5 = vld [vmem:[%s843_s2 + $0x10] sm:$0xff]  ;;  %v719_v6 = vmov 0   ;;  %v326_v7 = vld [vmem:[%s843_s2 + $0x8] sm:$0xff]  ;;  %s304_s25 = scalar_select %p303_p9, %s709_s20, 3  ;;  %vm379_vm0 = vcmask 261120  }
  0x1e   : > { %418 = vmatprep.mubr.bf16.mxu0 %v719_v6  ;;  %670 = vset.pattern.permute.xlu1 %v719_v6  ;;  %v328_v8 = vld [vmem:[%s843_s2 + $0x18] sm:$0xff]  ;;  %v674_v11 = vld [vmem:[%s270_s24 + $0x4] ss:$8 sps:$4 sm:$0xff]   ;;  %v676_v12 = vld [vmem:[%s270_s24] ss:$8 sps:$4 sm:$0xff]   ;;  %s854_s10 = smov (!%p310_p10, %s613_s10), 7 }
  0x1f   : > { %331 = vperm.xlu1 %670, %v325_v4   ;;  %669 = vset.pattern.permute.xlu0 %v719_v6  ;;  %v671_v9 = vld [vmem:[%s270_s24 + $0x14] ss:$8 sps:$4 sm:$0xff]   ;;  %v673_v10 = vld [vmem:[%s270_s24 + $0x10] ss:$8 sps:$4 sm:$0xff]   ;;  %s627_s27 = sshll.u32 %s304_s25, 4  ;;  %s614_s11 = sshll.u32 %s854_s10, 2 }
  0x20   : > { %341 = vperm.xlu0 %669, %v327_v5   ;;  %501 = vmatprep.mubr.bf16.mxu1 %v719_v6  ;;  %s307_s30 = scalar_lea.vmem %s842_s1, %s627_s27  ;;  %v460_v13 = vld [vmem:[%s845_s4] sm:$0x7]  ;;  %s313_s14 = scalar_lea.vmem %s846_s5, %s614_s11 }
  0x21   : > { %398 = vmatprep.subr.bf16.mxu0 %v671_v9  ;;  %v677_v14 = vld [vmem:[%s307_s30] sm:$0xff]   ;;  %v678_v15 = vld [vmem:[%s307_s30 + $0x8] sm:$0xff]  }
  0x22   : > { %399 = vmatpush1.bf16.msra.mxu0 %v673_v10  ;;  %v455_v56 = vld [vmem:[%s844_s3] sm:$0x3] }
  0x23   : > { %336 = vperm.xlu1 %670, %v326_v7   ;;  %400 = vmatprep.subr.bf16.mxu0 %v674_v11 }
  0x24   : > { %346 = vperm.xlu0 %669, %v328_v8  }
  0x26   : > { %401 = vmatpush1.bf16.msra.mxu0 %v676_v12 }
  0x28   : > { %463 = vperm.xlu0 %669, %v460_v13  }
  0x29   : > { %621 = vmatmul.mubr.msk.bf16.vlgmr.msra.gmra.mxu0 %vm379_vm0, %v677_v14 }
  0x2a   : > { %428 = vmatprep.mubr.bf16.mxu0 %v719_v6 }
  0x31   : > { %622 = vmatmul.mubr.msk.bf16.gmra.mxu0 %vm379_vm0, %v678_v15 }
  0x9a   : > { %v332_v18 = vpop.permute.xlu1 %331 }
  0x9b   : > { %v342_v20 = vpop.permute.xlu0 %341 }
  0x9e   : > { %v337_v23 = vpop.permute.xlu1 %336 }
  0x9f   : > { %v347_v27 = vpop.permute.xlu0 %346 }
  0xa3   : > { %v464_v58 = vpop.permute.xlu0 %463 }
  0xe9   : > { %v420_v16 = vpop.f32.mrf.mxu0 }
  0xea   : > { %v421_v38 = vadd.f32 %v420_v16, %v332_v18 }
  0xeb   : > { %v422_v17 = vpop.f32.mrf.mxu0 }
  0xec   : > { %v423_v30 = vadd.f32 %v422_v17, %v332_v18  ;;  %v439_v47 = vmul.f32 0.2, %v421_v38 }
  0xed   : > { %v424_v19 = vpop.f32.mrf.mxu0 }
  0xee   : > { %v425_v32 = vadd.f32 %v424_v19, %v337_v23  ;;  %v440_v40 = vmul.f32 0.2, %v423_v30  ;;  %v447_v54 = vmax.f32 %v421_v38, %v439_v47 }
  0xef   : > { %v426_v21 = vpop.f32.mrf.mxu0 }
  0xf0   : > { %v427_v25 = vadd.f32 %v426_v21, %v337_v23  ;;  %v441_v42 = vmul.f32 0.2, %v425_v32  ;;  %v448_v49 = vmax.f32 %v423_v30, %v440_v40 }
  0xf1   : > { %v430_v22 = vpop.f32.mrf.mxu0 }
  0xf2   : > { %v431_v28 = vadd.f32 %v430_v22, %v342_v20  ;;  %v442_v34 = vmul.f32 0.2, %v427_v25  ;;  %v449_v51 = vmax.f32 %v425_v32, %v441_v42 }
  0xf3   : > { %v432_v24 = vpop.f32.mrf.mxu0 }
  0xf4   : > { %v433_v26 = vadd.f32 %v432_v24, %v342_v20  ;;  %v443_v39 = vmul.f32 0.2, %v431_v28  ;;  %v450_v44 = vmax.f32 %v427_v25, %v442_v34  ;;  %v456_v55 = vpack.c.bf16 %v449_v51, %v447_v54 }
  0xf5   : > { %v434_v29 = vpop.f32.mrf.mxu0 }
  0xf6   : > { %v435_v31 = vadd.f32 %v434_v29, %v347_v27  ;;  %v444_v35 = vmul.f32 0.2, %v433_v26  ;;  %v451_v48 = vmax.f32 %v431_v28, %v443_v39  ;;  %v457_v53 = vpack.c.bf16 %v450_v44, %v448_v49 }
  0xf7   : > { %v436_v33 = vpop.f32.mrf.mxu0 }
  0xf8   : > { %v445_v36 = vmul.f32 0.2, %v435_v31  ;;  %v437_v37 = vadd.f32 %v436_v33, %v347_v27  ;;  %v452_v45 = vmax.f32 %v433_v26, %v444_v35 }
  0xfa   : > { %v446_v41 = vmul.f32 0.2, %v437_v37  ;;  %v453_v43 = vmax.f32 %v435_v31, %v445_v36 }
  0xfc   : > { %v454_v46 = vmax.f32 %v437_v37, %v446_v41  ;;  %v458_v52 = vpack.c.bf16 %v453_v43, %v451_v48 }
  0xfe   : > { %v459_v50 = vpack.c.bf16 %v454_v46, %v452_v45 }
 0x100   : > { %481 = vmatprep.subr.bf16.mxu1 %v459_v50 }
 0x101   : > { %482 = vmatpush1.bf16.msra.mxu1 %v458_v52 }
 0x102   : > { %483 = vmatprep.subr.bf16.mxu1 %v457_v53 }
 0x105   : > { %484 = vmatpush1.bf16.msra.mxu1 %v456_v55 }
 0x108   : > { %623 = vmatmul.mubr.msk.bf16.vlgmr.msra.gmra.mxu1 %vm379_vm0, %v455_v56 }
 0x1c8   : > { %v503_v57 = vpop.f32.mrf.mxu1 }
 0x1c9   : > { %v504_v60 = vadd.f32 %v503_v57, %v464_v58 }
 0x1ca   : > { %v505_v59 = vpop.f32.mrf.mxu1 }
 0x1cb   : > { %v506_v61 = vadd.f32 %v505_v59, %v464_v58 }
 0x1cc   : > { %v507_v62 = vpop.f32.mrf.mxu1 }
 0x1cd   : > { %v512_v63 = vcombine.low %v504_v60, %v506_v61 }
 0x1ce   : > { %v508_v0 = vpop.f32.mrf.mxu1 }
 0x1cf   : > { %514 = vst [vmem:[%s313_s14] sm:$0x77] %v512_v63 }
 0x1d0 PF: > { %s15_s22 = sadd.s32 1, %s717_s22   ;;  %s847_s18 = smov %s705_s19 }
 0x1d1   : > { %p12_p11 = scmp.ge.s32.totalorder %s15_s22, 6   ;;  %s848_s19 = smov %s785_s26 }
 0x1d2   : > { %s849_s20 = smov %s713_s21  ;;  %s850_s21 = smov %s852_s23 }
 0x1d3   :  { %14 = sbr.rel (!%p12_p11) target bundleno = 3 (0x3), region = 116 }

</bundles_post_ra>
